<compile_context>
chip_gen: v5e
topology: v5e:2x2
jax: 0.10.0
libtpu: 0.0.40
codegen_flags: <defaults>
</compile_context>

<pallas_src>
import jax
import jax.numpy as jnp
from jax.experimental import pallas as pl
from jax.experimental.pallas import tpu as pltpu


# ----------------------------------------------------------------------------
# Module glue (filter bank + padding), straight port of the PyTorch code.
# ----------------------------------------------------------------------------
def compute_pad(stride, k, s):
    if s % stride == 0:
        return max(k - stride, 0)
    return max(k - s % stride, 0)


def get_filters(delta, gamma, center, length):
    """JAX port of TSF.get_filters on the SubConv path (deltas unused: a == 0)."""
    centers = (length - 1) * (center + 1.0) / 2.0              # (N,)
    gammas = jnp.exp(1.5 - 2.0 * jnp.abs(gamma))                # (N,)
    b = jnp.arange(length, dtype=jnp.float32)                   # (L,)
    f = (b[None, :] - centers[:, None]) / gammas[:, None]       # (N, L)
    f = f * f + 1.0
    f = jnp.pi * gammas[:, None] * f
    f = 1.0 / f
    f = f / (jnp.sum(f, axis=1, keepdims=True) + 1e-6)
    return f


def _round_up(x, m):
    return ((x + m - 1) // m) * m


def _vmem_budget_bytes():
    """Per-generation VMEM budget for the double-buffered in/out blocks."""
    try:
        kind = jax.devices()[0].device_kind.lower()
    except Exception:
        kind = ""
    if "v5" in kind:
        return 12 * 1024 * 1024   # v5e: 16 MiB default scoped VMEM -> conservative
    return 24 * 1024 * 1024       # v6e / v7x (v7x: 64 MiB physical per TC)


# ----------------------------------------------------------------------------
# Kernel
# ----------------------------------------------------------------------------
def _make_kernel(n_f, l_k, t_out, pad_f, pad_b, x_off, row_chunk):
    """Builds the SubConv kernel for a static (N, L, T, padding, chunk) config."""

    def kernel(k_ref, x_ref, o_ref, xp_ref):
        # k_ref : SMEM (N, L) f32 filter taps (read as scalars).
        # x_ref : VMEM (tb, tc, T) input rows, time on lanes.
        # o_ref : VMEM (tb, N, tc, T) output block == contiguous slab of (B,N,C,T).
        # xp_ref: VMEM (row_chunk, x_off + T + pad_b) staging scratch; the input
        #         chunk lives at lane offset x_off (a multiple of 128), the pad
        #         columns around it stay zero.
        tb, tc, _ = x_ref.shape
        f32 = jnp.float32

        # Zero the scratch once per grid step; only the pad columns actually
        # need it (they are never overwritten below).
        if pad_f > 0 or pad_b > 0:
            xp_ref[...] = jnp.zeros(xp_ref.shape, f32)

        def process(b, r0, cr):
            # Stage one zero-padded row-chunk in VMEM (aligned store at x_off);
            # this replaces the XLA pad pass over HBM.
            xp_ref[0:cr, x_off:x_off + t_out] = (
                x_ref[b, pl.ds(r0, cr), :].astype(f32))
            # Taps outer: each lane-shifted slice is loaded once (XLU shift);
            # filters inner: n_f live f32 accumulators (fits the vreg file).
            accs = [None] * n_f
            for l in range(l_k):
                off = x_off - pad_f + l
                xl = xp_ref[0:cr, off:off + t_out]          # (cr, T)
                for n in range(n_f):
                    term = k_ref[n, l] * xl
                    accs[n] = term if l == 0 else accs[n] + term
            for n in range(n_f):
                o_ref[b, n, pl.ds(r0, cr), :] = accs[n].astype(o_ref.dtype)

        n_full = tc // row_chunk
        rem = tc - n_full * row_chunk
        for b in range(tb):                                  # tb is small & static
            if 0 < n_full <= 4:                              # short: static offsets
                for c in range(n_full):
                    process(b, c * row_chunk, row_chunk)
            elif n_full > 4:                                 # long: real loop
                @pl.loop(0, n_full)
                def _(c, b=b):
                    process(b, pl.multiple_of(c * row_chunk, 8), row_chunk)
            if rem > 0:
                process(b, n_full * row_chunk, rem)

    return kernel


# ----------------------------------------------------------------------------
# Wrapper
# ----------------------------------------------------------------------------
def subconv_forward(x, center, delta, gamma, length):
    """x: (B, C, T) float32 -> (B, N, C, T), matching SubConv.forward."""
    B, C, T = (int(d) for d in x.shape)
    N = int(center.shape[0])
    L = int(length)

    # Tiny param-derived filter bank; goes to SMEM.
    k = get_filters(jnp.tanh(delta), jnp.tanh(gamma), jnp.tanh(center), L)
    k = k.astype(jnp.float32)                                 # (N, L)

    # Same padding scheme as the torch module.
    p = compute_pad(1, L, T)
    pad_f = p // 2
    pad_b = p - pad_f
    x_off = _round_up(pad_f, 128) if pad_f > 0 else 0         # aligned staging offset
    scratch_w = x_off + T + pad_b

    # ---- generation-aware tile sizing (HBM-bound: maximize per-step traffic) ----
    budget = _vmem_budget_bytes()
    t_lanes = _round_up(T, 128)
    lane_tiles = t_lanes // 128
    # Inner row-chunk so (1 slice + N accumulators + temps) stays in ~48 vregs.
    row_chunk = 8 * max(1, 48 // ((N + 2) * lane_tiles))
    scratch_bytes = _round_up(row_chunk, 8) * _round_up(scratch_w, 128) * 4

    row_hbm = 4 * T * (1 + N)                    # HBM bytes per (b, c) row per step
    row_vmem = 2 * 4 * t_lanes * (1 + N)         # double-buffered in+out VMEM per row
    max_rows = max(1, (budget - scratch_bytes) // row_vmem)

    if C <= max_rows or C <= 8:
        tc = C                                   # whole channel dim per block
    else:
        tc = max(8, (min(max_rows, C) // 8) * 8) # sublane-aligned channel tile

    tb = 1
    if tc == C:
        target_rows = max(1, (2 * 1024 * 1024) // row_hbm)    # >= ~2 MiB per step
        tb = max(1, min(B, target_rows // max(C, 1), max_rows // max(C, 1)))
        if B >= 2:
            tb = min(tb, -(-B // 2))             # keep >= 2 grid steps (v7x megacore)
    if tb >= B and tc >= C and C >= 16 and C % 16 == 0:
        tc = C // 2                              # B == 1: split channels for megacore
    row_chunk = min(row_chunk, tc)

    grid = (pl.cdiv(B, tb), pl.cdiv(C, tc))

    # vmem_limit from the actual (tile-padded) footprint + headroom.
    in_blk = tb * _round_up(tc, 8) * t_lanes * 4
    out_blk = tb * N * _round_up(tc, 8) * t_lanes * 4
    footprint = 2 * (in_blk + out_blk) + scratch_bytes
    vmem_limit = int(max(16 * 1024 * 1024, footprint + 4 * 1024 * 1024))

    kernel = _make_kernel(N, L, T, pad_f, pad_b, x_off, row_chunk)

    out = pl.pallas_call(
        kernel,
        out_shape=jax.ShapeDtypeStruct((B, N, C, T), x.dtype),
        grid_spec=pltpu.PrefetchScalarGridSpec(
            num_scalar_prefetch=0,
            grid=grid,
            in_specs=[
                pl.BlockSpec(memory_space=pltpu.MemorySpace.SMEM),        # (N, L) taps
                pl.BlockSpec((tb, tc, T), lambda bi, ci: (bi, ci, 0)),    # input rows
            ],
            out_specs=pl.BlockSpec((tb, N, tc, T), lambda bi, ci: (bi, 0, ci, 0)),
            scratch_shapes=[pltpu.VMEM((row_chunk, scratch_w), jnp.float32)],
        ),
        compiler_params=pltpu.CompilerParams(
            dimension_semantics=("parallel", "parallel"),
            vmem_limit_bytes=vmem_limit,
        ),
    )(k, x)
    return out


if __name__ == "__main__":
    B, C, T = 2, 4, 16   # small shapes consistent with the module
    N, L = 3, 8          # SubConv(inp=C, num_f=N, length=L)

    key = jax.random.PRNGKey(0)
    kx, kc, kd, kg = jax.random.split(key, 4)
    x = jax.random.normal(kx, (B, C, T), jnp.float32)
    # Deterministic parameter init mirroring TSF.__init__ normal_ std values.
    center = 0.5 * jax.random.normal(kc, (N,), jnp.float32)
    delta = 0.01 * jax.random.normal(kd, (N,), jnp.float32)
    gamma = 0.0001 * jax.random.normal(kg, (N,), jnp.float32)

    out = subconv_forward(x, center, delta, gamma, L)
    out = jax.block_until_ready(out)
    assert out.shape == (B, N, C, T), out.shape

    # Independent pure-JAX reference (im2col + einsum), matching F.conv2d.
    kf = get_filters(jnp.tanh(delta), jnp.tanh(gamma), jnp.tanh(center), L)
    p = compute_pad(1, L, T)
    pad_f = p // 2
    xp_ref = jnp.pad(x, ((0, 0), (0, 0), (pad_f, p - pad_f))).reshape(B * C, T + p)
    idx = jnp.arange(T)[:, None] + jnp.arange(L)[None, :]          # (T, L)
    patches = xp_ref[:, idx]                                        # (M, T, L)
    ref = jnp.einsum("mtl,nl->mnt", patches, kf)
    ref = ref.reshape(B, C, N, T).transpose(0, 2, 1, 3)
    assert jnp.allclose(out, ref, atol=1e-5, rtol=1e-5), float(jnp.max(jnp.abs(out - ref)))

    print("KERNEL_OK")
</pallas_src>

<mosaic_0001>
module attributes {stable_mosaic.version = 11 : i64} {
  func.func @kernel(%arg0: i32, %arg1: i32, %arg2: memref<3x8xf32, #tpu.memory_space<smem>>, %arg3: memref<1x4x16xf32, #tpu.memory_space<vmem>>, %arg4: memref<1x3x4x16xf32, #tpu.memory_space<vmem>>, %arg5: memref<4x148xf32, #tpu.memory_space<vmem>>) attributes {dimension_semantics = [#tpu.dimension_semantics<parallel>, #tpu.dimension_semantics<parallel>], iteration_bounds = array<i64: 2, 1>, scalar_prefetch = 0 : i64, scratch_operands = 1 : i64, tpu.core_type = #tpu.core_type<tc>, window_params = [{transform_indices = @transform_0, window_bounds = array<i64: 3, 8>}, {transform_indices = @transform_1, window_bounds = array<i64: 1, 4, 16>}, {transform_indices = @transform_2, window_bounds = array<i64: 1, 3, 4, 16>}]} {
    %cst = arith.constant 0.000000e+00 : f32
    %0 = vector.broadcast %cst : f32 to vector<4x148xf32>
    %c0 = arith.constant 0 : index
    %c0_0 = arith.constant 0 : index
    %1 = vector.load %arg5[%c0, %c0_0] : memref<4x148xf32, #tpu.memory_space<vmem>>, vector<4x148xf32>
    tpu.vector_store %arg5[%c0, %c0_0], %0 {strides = array<i32>} : memref<4x148xf32, #tpu.memory_space<vmem>>, vector<4x148xf32>,
    %c0_1 = arith.constant 0 : index
    %c0_2 = arith.constant 0 : index
    %c0_3 = arith.constant 0 : index
    %2 = vector.load %arg3[%c0_1, %c0_2, %c0_3] : memref<1x4x16xf32, #tpu.memory_space<vmem>>, vector<1x4x16xf32>
    %3 = vector.shape_cast %2 : vector<1x4x16xf32> to vector<4x16xf32>
    %c0_4 = arith.constant 0 : index
    %c128 = arith.constant 128 : index
    %4 = vector.load %arg5[%c0_4, %c128] : memref<4x148xf32, #tpu.memory_space<vmem>>, vector<4x16xf32>
    tpu.vector_store %arg5[%c0_4, %c128], %3 {strides = array<i32>} : memref<4x148xf32, #tpu.memory_space<vmem>>, vector<4x16xf32>,
    %c0_5 = arith.constant 0 : index
    %c125 = arith.constant 125 : index
    %5 = vector.load %arg5[%c0_5, %c125] : memref<4x148xf32, #tpu.memory_space<vmem>>, vector<4x16xf32>
    %c0_6 = arith.constant 0 : index
    %c0_7 = arith.constant 0 : index
    %6 = memref.load %arg2[%c0_6, %c0_7] : memref<3x8xf32, #tpu.memory_space<smem>>
    %7 = vector.broadcast %6 : f32 to vector<4x16xf32>
    %8 = arith.mulf %7, %5 : vector<4x16xf32>
    %c1 = arith.constant 1 : index
    %c0_8 = arith.constant 0 : index
    %9 = memref.load %arg2[%c1, %c0_8] : memref<3x8xf32, #tpu.memory_space<smem>>
    %10 = vector.broadcast %9 : f32 to vector<4x16xf32>
    %11 = arith.mulf %10, %5 : vector<4x16xf32>
    %c2 = arith.constant 2 : index
    %c0_9 = arith.constant 0 : index
    %12 = memref.load %arg2[%c2, %c0_9] : memref<3x8xf32, #tpu.memory_space<smem>>
    %13 = vector.broadcast %12 : f32 to vector<4x16xf32>
    %14 = arith.mulf %13, %5 : vector<4x16xf32>
    %c0_10 = arith.constant 0 : index
    %c126 = arith.constant 126 : index
    %15 = vector.load %arg5[%c0_10, %c126] : memref<4x148xf32, #tpu.memory_space<vmem>>, vector<4x16xf32>
    %c0_11 = arith.constant 0 : index
    %c1_12 = arith.constant 1 : index
    %16 = memref.load %arg2[%c0_11, %c1_12] : memref<3x8xf32, #tpu.memory_space<smem>>
    %17 = vector.broadcast %16 : f32 to vector<4x16xf32>
    %18 = arith.mulf %17, %15 : vector<4x16xf32>
    %19 = arith.addf %8, %18 : vector<4x16xf32>
    %c1_13 = arith.constant 1 : index
    %c1_14 = arith.constant 1 : index
    %20 = memref.load %arg2[%c1_13, %c1_14] : memref<3x8xf32, #tpu.memory_space<smem>>
    %21 = vector.broadcast %20 : f32 to vector<4x16xf32>
    %22 = arith.mulf %21, %15 : vector<4x16xf32>
    %23 = arith.addf %11, %22 : vector<4x16xf32>
    %c2_15 = arith.constant 2 : index
    %c1_16 = arith.constant 1 : index
    %24 = memref.load %arg2[%c2_15, %c1_16] : memref<3x8xf32, #tpu.memory_space<smem>>
    %25 = vector.broadcast %24 : f32 to vector<4x16xf32>
    %26 = arith.mulf %25, %15 : vector<4x16xf32>
    %27 = arith.addf %14, %26 : vector<4x16xf32>
    %c0_17 = arith.constant 0 : index
    %c127 = arith.constant 127 : index
    %28 = vector.load %arg5[%c0_17, %c127] : memref<4x148xf32, #tpu.memory_space<vmem>>, vector<4x16xf32>
    %c0_18 = arith.constant 0 : index
    %c2_19 = arith.constant 2 : index
    %29 = memref.load %arg2[%c0_18, %c2_19] : memref<3x8xf32, #tpu.memory_space<smem>>
    %30 = vector.broadcast %29 : f32 to vector<4x16xf32>
    %31 = arith.mulf %30, %28 : vector<4x16xf32>
    %32 = arith.addf %19, %31 : vector<4x16xf32>
    %c1_20 = arith.constant 1 : index
    %c2_21 = arith.constant 2 : index
    %33 = memref.load %arg2[%c1_20, %c2_21] : memref<3x8xf32, #tpu.memory_space<smem>>
    %34 = vector.broadcast %33 : f32 to vector<4x16xf32>
    %35 = arith.mulf %34, %28 : vector<4x16xf32>
    %36 = arith.addf %23, %35 : vector<4x16xf32>
    %c2_22 = arith.constant 2 : index
    %c2_23 = arith.constant 2 : index
    %37 = memref.load %arg2[%c2_22, %c2_23] : memref<3x8xf32, #tpu.memory_space<smem>>
    %38 = vector.broadcast %37 : f32 to vector<4x16xf32>
    %39 = arith.mulf %38, %28 : vector<4x16xf32>
    %40 = arith.addf %27, %39 : vector<4x16xf32>
    %c0_24 = arith.constant 0 : index
    %c128_25 = arith.constant 128 : index
    %41 = vector.load %arg5[%c0_24, %c128_25] : memref<4x148xf32, #tpu.memory_space<vmem>>, vector<4x16xf32>
    %c0_26 = arith.constant 0 : index
    %c3 = arith.constant 3 : index
    %42 = memref.load %arg2[%c0_26, %c3] : memref<3x8xf32, #tpu.memory_space<smem>>
    %43 = vector.broadcast %42 : f32 to vector<4x16xf32>
    %44 = arith.mulf %43, %41 : vector<4x16xf32>
    %45 = arith.addf %32, %44 : vector<4x16xf32>
    %c1_27 = arith.constant 1 : index
    %c3_28 = arith.constant 3 : index
    %46 = memref.load %arg2[%c1_27, %c3_28] : memref<3x8xf32, #tpu.memory_space<smem>>
    %47 = vector.broadcast %46 : f32 to vector<4x16xf32>
    %48 = arith.mulf %47, %41 : vector<4x16xf32>
    %49 = arith.addf %36, %48 : vector<4x16xf32>
    %c2_29 = arith.constant 2 : index
    %c3_30 = arith.constant 3 : index
    %50 = memref.load %arg2[%c2_29, %c3_30] : memref<3x8xf32, #tpu.memory_space<smem>>
    %51 = vector.broadcast %50 : f32 to vector<4x16xf32>
    %52 = arith.mulf %51, %41 : vector<4x16xf32>
    %53 = arith.addf %40, %52 : vector<4x16xf32>
    %c0_31 = arith.constant 0 : index
    %c129 = arith.constant 129 : index
    %54 = vector.load %arg5[%c0_31, %c129] : memref<4x148xf32, #tpu.memory_space<vmem>>, vector<4x16xf32>
    %c0_32 = arith.constant 0 : index
    %c4 = arith.constant 4 : index
    %55 = memref.load %arg2[%c0_32, %c4] : memref<3x8xf32, #tpu.memory_space<smem>>
    %56 = vector.broadcast %55 : f32 to vector<4x16xf32>
    %57 = arith.mulf %56, %54 : vector<4x16xf32>
    %58 = arith.addf %45, %57 : vector<4x16xf32>
    %c1_33 = arith.constant 1 : index
    %c4_34 = arith.constant 4 : index
    %59 = memref.load %arg2[%c1_33, %c4_34] : memref<3x8xf32, #tpu.memory_space<smem>>
    %60 = vector.broadcast %59 : f32 to vector<4x16xf32>
    %61 = arith.mulf %60, %54 : vector<4x16xf32>
    %62 = arith.addf %49, %61 : vector<4x16xf32>
    %c2_35 = arith.constant 2 : index
    %c4_36 = arith.constant 4 : index
    %63 = memref.load %arg2[%c2_35, %c4_36] : memref<3x8xf32, #tpu.memory_space<smem>>
    %64 = vector.broadcast %63 : f32 to vector<4x16xf32>
    %65 = arith.mulf %64, %54 : vector<4x16xf32>
    %66 = arith.addf %53, %65 : vector<4x16xf32>
    %c0_37 = arith.constant 0 : index
    %c130 = arith.constant 130 : index
    %67 = vector.load %arg5[%c0_37, %c130] : memref<4x148xf32, #tpu.memory_space<vmem>>, vector<4x16xf32>
    %c0_38 = arith.constant 0 : index
    %c5 = arith.constant 5 : index
    %68 = memref.load %arg2[%c0_38, %c5] : memref<3x8xf32, #tpu.memory_space<smem>>
    %69 = vector.broadcast %68 : f32 to vector<4x16xf32>
    %70 = arith.mulf %69, %67 : vector<4x16xf32>
    %71 = arith.addf %58, %70 : vector<4x16xf32>
    %c1_39 = arith.constant 1 : index
    %c5_40 = arith.constant 5 : index
    %72 = memref.load %arg2[%c1_39, %c5_40] : memref<3x8xf32, #tpu.memory_space<smem>>
    %73 = vector.broadcast %72 : f32 to vector<4x16xf32>
    %74 = arith.mulf %73, %67 : vector<4x16xf32>
    %75 = arith.addf %62, %74 : vector<4x16xf32>
    %c2_41 = arith.constant 2 : index
    %c5_42 = arith.constant 5 : index
    %76 = memref.load %arg2[%c2_41, %c5_42] : memref<3x8xf32, #tpu.memory_space<smem>>
    %77 = vector.broadcast %76 : f32 to vector<4x16xf32>
    %78 = arith.mulf %77, %67 : vector<4x16xf32>
    %79 = arith.addf %66, %78 : vector<4x16xf32>
    %c0_43 = arith.constant 0 : index
    %c131 = arith.constant 131 : index
    %80 = vector.load %arg5[%c0_43, %c131] : memref<4x148xf32, #tpu.memory_space<vmem>>, vector<4x16xf32>
    %c0_44 = arith.constant 0 : index
    %c6 = arith.constant 6 : index
    %81 = memref.load %arg2[%c0_44, %c6] : memref<3x8xf32, #tpu.memory_space<smem>>
    %82 = vector.broadcast %81 : f32 to vector<4x16xf32>
    %83 = arith.mulf %82, %80 : vector<4x16xf32>
    %84 = arith.addf %71, %83 : vector<4x16xf32>
    %c1_45 = arith.constant 1 : index
    %c6_46 = arith.constant 6 : index
    %85 = memref.load %arg2[%c1_45, %c6_46] : memref<3x8xf32, #tpu.memory_space<smem>>
    %86 = vector.broadcast %85 : f32 to vector<4x16xf32>
    %87 = arith.mulf %86, %80 : vector<4x16xf32>
    %88 = arith.addf %75, %87 : vector<4x16xf32>
    %c2_47 = arith.constant 2 : index
    %c6_48 = arith.constant 6 : index
    %89 = memref.load %arg2[%c2_47, %c6_48] : memref<3x8xf32, #tpu.memory_space<smem>>
    %90 = vector.broadcast %89 : f32 to vector<4x16xf32>
    %91 = arith.mulf %90, %80 : vector<4x16xf32>
    %92 = arith.addf %79, %91 : vector<4x16xf32>
    %c0_49 = arith.constant 0 : index
    %c132 = arith.constant 132 : index
    %93 = vector.load %arg5[%c0_49, %c132] : memref<4x148xf32, #tpu.memory_space<vmem>>, vector<4x16xf32>
    %c0_50 = arith.constant 0 : index
    %c7 = arith.constant 7 : index
    %94 = memref.load %arg2[%c0_50, %c7] : memref<3x8xf32, #tpu.memory_space<smem>>
    %95 = vector.broadcast %94 : f32 to vector<4x16xf32>
    %96 = arith.mulf %95, %93 : vector<4x16xf32>
    %97 = arith.addf %84, %96 : vector<4x16xf32>
    %c1_51 = arith.constant 1 : index
    %c7_52 = arith.constant 7 : index
    %98 = memref.load %arg2[%c1_51, %c7_52] : memref<3x8xf32, #tpu.memory_space<smem>>
    %99 = vector.broadcast %98 : f32 to vector<4x16xf32>
    %100 = arith.mulf %99, %93 : vector<4x16xf32>
    %101 = arith.addf %88, %100 : vector<4x16xf32>
    %c2_53 = arith.constant 2 : index
    %c7_54 = arith.constant 7 : index
    %102 = memref.load %arg2[%c2_53, %c7_54] : memref<3x8xf32, #tpu.memory_space<smem>>
    %103 = vector.broadcast %102 : f32 to vector<4x16xf32>
    %104 = arith.mulf %103, %93 : vector<4x16xf32>
    %105 = arith.addf %92, %104 : vector<4x16xf32>
    %c0_55 = arith.constant 0 : index
    %c0_56 = arith.constant 0 : index
    %c0_57 = arith.constant 0 : index
    %c0_58 = arith.constant 0 : index
    %106 = vector.load %arg4[%c0_55, %c0_56, %c0_57, %c0_58] : memref<1x3x4x16xf32, #tpu.memory_space<vmem>>, vector<1x1x4x16xf32>
    %107 = vector.shape_cast %106 : vector<1x1x4x16xf32> to vector<4x16xf32>
    %108 = vector.shape_cast %97 : vector<4x16xf32> to vector<1x1x4x16xf32>
    tpu.vector_store %arg4[%c0_55, %c0_56, %c0_57, %c0_58], %108 {strides = array<i32>} : memref<1x3x4x16xf32, #tpu.memory_space<vmem>>, vector<1x1x4x16xf32>,
    %c0_59 = arith.constant 0 : index
    %c1_60 = arith.constant 1 : index
    %c0_61 = arith.constant 0 : index
    %c0_62 = arith.constant 0 : index
    %109 = vector.load %arg4[%c0_59, %c1_60, %c0_61, %c0_62] : memref<1x3x4x16xf32, #tpu.memory_space<vmem>>, vector<1x1x4x16xf32>
    %110 = vector.shape_cast %109 : vector<1x1x4x16xf32> to vector<4x16xf32>
    %111 = vector.shape_cast %101 : vector<4x16xf32> to vector<1x1x4x16xf32>
    tpu.vector_store %arg4[%c0_59, %c1_60, %c0_61, %c0_62], %111 {strides = array<i32>} : memref<1x3x4x16xf32, #tpu.memory_space<vmem>>, vector<1x1x4x16xf32>,
    %c0_63 = arith.constant 0 : index
    %c2_64 = arith.constant 2 : index
    %c0_65 = arith.constant 0 : index
    %c0_66 = arith.constant 0 : index
    %112 = vector.load %arg4[%c0_63, %c2_64, %c0_65, %c0_66] : memref<1x3x4x16xf32, #tpu.memory_space<vmem>>, vector<1x1x4x16xf32>
    %113 = vector.shape_cast %112 : vector<1x1x4x16xf32> to vector<4x16xf32>
    %114 = vector.shape_cast %105 : vector<4x16xf32> to vector<1x1x4x16xf32>
    tpu.vector_store %arg4[%c0_63, %c2_64, %c0_65, %c0_66], %114 {strides = array<i32>} : memref<1x3x4x16xf32, #tpu.memory_space<vmem>>, vector<1x1x4x16xf32>,
    return
  }
  func.func @transform_0(%arg0: i32, %arg1: i32) -> (i32, i32) {
    %c0_i32 = arith.constant 0 : i32
    %c0_i32_0 = arith.constant 0 : i32
    %c0_i32_1 = arith.constant 0 : i32
    return %c0_i32, %c0_i32_0 : i32, i32
  }
  func.func @transform_1(%arg0: i32, %arg1: i32) -> (i32, i32, i32) {
    %c0_i32 = arith.constant 0 : i32
    %c0_i32_0 = arith.constant 0 : i32
    return %arg0, %arg1, %c0_i32 : i32, i32, i32
  }
  func.func @transform_2(%arg0: i32, %arg1: i32) -> (i32, i32, i32, i32) {
    %c0_i32 = arith.constant 0 : i32
    %c0_i32_0 = arith.constant 0 : i32
    %c0_i32_1 = arith.constant 0 : i32
    return %arg0, %c0_i32, %arg1, %c0_i32_0 : i32, i32, i32, i32
  }
}

</mosaic_0001>

<bundles_post_ra>
// kernel: tpu_custom_call.1
= control target key start
LH: loop header
LB: loop body
LE: loop exit
PB: predicated region body
PF: predicated region fallthrough
CT: control target
= control target key end

     0   :  { %7 = vsyncpa [#allocation6], 0  ;;  %s1089_s0 = inlined_call_operand.hbm [shape: f32[3,8], index: 0, kind: input, shape index: {}]   ;;  %s1090_s1 = inlined_call_operand.hbm [shape: f32[2,4,16], index: 1, kind: input, shape index: {}]   ;;  %s1091_s2 = inlined_call_operand.hbm [shape: f32[2,3,4,16], index: 2, kind: output, shape index: {}]  }
   0x1   :  { %8 = vsyncpa [#allocation4], 0 }
   0x2   :  { %10 = vsyncpa [#allocation4 + $0x1], 0 }
   0x3   :  { %11 = vsyncpa [#allocation5], 0 }
   0x4   :  { %13 = vsyncpa [#allocation5 + $0x1], 0  ;;  %s860_s9 = smov 0   ;;  %s862_s10 = smov 0  }
   0x5   :  { %s864_s11 = smov 0   ;;  %s866_s12 = smov 0  }
   0x6   :  { %s868_s13 = smov 0   ;;  %s870_s14 = smov 0  }
   0x7 LB: > { %s576_s15 = sadd.s32 4294967295, %s831_s14   ;;  %s577_s16 = sadd.s32 4294967294, %s831_s14   ;;  %s831_s14 = sphi %s870_s14, %s19_s14   ;;  %s827_s13 = sphi %s868_s13, %s1103_s13   ;;  %s823_s12 = sphi %s866_s12, %s1102_s12   ;;  %s819_s11 = sphi %s864_s11, %s1101_s11   ;;  %s815_s10 = sphi %s862_s10, %s1100_s10   ;;  %s811_s9 = sphi %s860_s9, %s1099_s9  }
   0x8   : > { %p74_p0 = scmp.ne.s32.totalorder %s815_s10, %s811_s9  ;;  %p894_p1 = scmp.eq.s32.totalorder %s576_s15, 0 }
   0x9   : > { %p898_p2 = scmp.eq.s32.totalorder %s576_s15, 1  ;;  %p106_p3 = scmp.eq.s32.totalorder %s577_s16, 1 }
   0xa   : > { %p904_p4 = por %p894_p1, %p74_p0  ;;  %p578_p5 = scmp.ge.s32.totalorder %s831_s14, 1 }
   0xb   : > { %p909_p6 = por %p106_p3, %p74_p0  ;;  %p113_p7 = scmp.lt.s32.totalorder %s831_s14, 3 }
   0xc   : > { %s125_s23 = sshll.u32 %s1089_s0, 4  ;;  %s31_s25 = sadd.s32 1, %s827_s13  ;;  %s126_s23 = int_to_ptr.hbm [resolvable:$true] %s125_s23 }
   0xd   : > { %p917_p8 = pnand %p578_p5, %p113_p7  ;;  %s61_s26 = sadd.s32 1, %s819_s11 }
   0xe   : > { %p33_p12 = scmp.ge.s32.totalorder %s31_s25, 2  ;;  %s833_s27 = smov [#allocation3]  }
   0xf   : > { %p624_p10 = pneg %p917_p8  ;;  %p68_p13 = scmp.ne.s32.totalorder %s819_s11, %s815_s10 }
  0x10   : > { %s1105_s25 = smov (%p33_p12, %s31_s25), 0  ;;  %p69_p0 = scmp.eq.s32.totalorder %s831_s14, 0 }
  0x11   : > { %p625_p11 = pnand %p624_p10, %p894_p1  ;;  %s56_s28 = ssub.s32 %s827_s13, %s1105_s25 }
  0x12   : > { %p637_p3 = scmp.lt.s32.totalorder %s831_s14, 2  ;;  %p59_p5 = scmp.eq.s32.totalorder %s56_s28, 0 }
  0x13   : > { %627 = dma.hbm_to_smem (!%p625_p11), %s126_s23, 64, %s833_s27, [#allocation6]  }
  0x14   : > { %p70_p7 = por %p69_p0, %p68_p13  ;;  %p938_p9 = por %p898_p2, %p68_p13 }
  0x15   : > { %s136_s30 = sand.u32 1, %s819_s11   ;;  %s582_s5 = sshll.u32 %s827_s13, 2 }
  0x16   : > { %s944_s3 = scalar_select %p59_p5, %s819_s11, %s61_s26  }
  0x17   : > { %s581_s4 = sshll.u32 %s136_s30, 2  ;;  %s145_s8 = scalar_lea.hbm %s1090_s1, %s582_s5 }
  0x18   : > { %s140_s15 = scalar_lea.vmem [#allocation7], %s581_s4  ;;  %s147_s21 = sshll.u32 %s145_s8, 4  ;;  %s148_s21 = int_to_ptr.hbm [resolvable:$true] %s147_s21 }
  0x19   : > { %s149_s16 = sshll.u32 %s140_s15, 4  ;;  %p629_p10 = pnand %p637_p3, %p70_p7  ;;  %s150_s16 = int_to_ptr.vmem [resolvable:$true] %s149_s16 }
  0x1a   : > { %s137_s18 = scalar_lea.sflag [#allocation4], %s136_s30  ;;  %158 = sbr.rel (%p917_p8) target bundleno = 352 (0x160), region = 28 }
  0x1b   : > { %631 = dma.hbm_to_vmem [thread:$0]  (!%p629_p10), %s148_s21, 64, %s150_s16, %s137_s18  }
  0x1f   : > { %798 = dma.done.wait (%p894_p1), [#allocation6], 64  }
  0x20   : > { %800 = vsyncadd (%p894_p1), [#allocation6], 4294967232  ;;  %s959_s22 = sand.u32 1, %s815_s10  }
  0x21   : > { %s585_s23 = sshll.u32 %s959_s22, 2  ;;  %s166_s26 = scalar_lea.sflag [#allocation4], %s959_s22 }
  0x22   : > { %s169_s27 = scalar_lea.vmem [#allocation7], %s585_s23 }
  0x23   : > { %802 = dma.done.wait (%p904_p4), %s166_s26, 64  }
  0x24   : > { %804 = vsyncadd (%p904_p4), %s166_s26, 4294967232 }
  0x25   : > { %175 = sfence }
  0x26   : > { %vm192_vm0 = vcmask 1043456   ;;  %vm193_vm1 = vcmask 162820   ;;  %v196_v0 = vld [vmem:[%s169_s27] sm:$0xf]  ;;  %vm197_vm2 = vcmask 125952   ;;  %s594_s17 = sld [smem:[#allocation3 + $0x3]] }
  0x27   : > { %vm194_vm3 = vmor %vm193_vm1, %vm192_vm0  ;;  %v834_v1 = vmov 0.0   ;;  %s588_s24 = sld [smem:[#allocation3 + $0x1]]  ;;  %s835_s5 = smov 125   ;;  %vm216_vm4 = vcmask 1039360   ;;  %vm247_vm5 = vcmask 1031168   ;;  %vm279_vm6 = vcmask 1022976  }
  0x28   : > { %195 = vst.msk [vmem:[#allocation2] sm:$0xff] %vm194_vm3, %v834_v1  ;;  %s597_s28 = sld [smem:[#allocation3 + $0x4]]  ;;  %s836_s6 = smov 127   ;;  %vm310_vm7 = vcmask 1014784   ;;  %vm341_vm8 = vcmask 1006592   ;;  %vm372_vm9 = vcmask 998400  }
  0x29   : > { %198 = vst.msk [vmem:[#allocation2 + $0x4] sm:$0xf] %vm197_vm2, %v196_v0  ;;  %s591_s30 = sld [smem:[#allocation3 + $0x2]]  ;;  %s837_s16 = smov 124   ;;  %vm403_vm10 = vcmask 990208   ;;  %vm435_vm11 = vcmask 23552  }
  0x2a   : > { %s589_s4 = sld [smem:[#allocation3 + $0x81]]  ;;  %s838_s21 = smov 126  }
  0x2b   : > { %s600_s19 = sld [smem:[#allocation3 + $0x5]]  ;;  %s839_s26 = smov 123  }
  0x2c   : > { %v273_v2 = vstv %s594_s17  ;;  %s603_s7 = sld [smem:[#allocation3 + $0x6]]  ;;  %s840_s17 = smov 122  }
  0x2d   : > { %v210_v3 = vstv %s588_s24  ;;  %s592_s8 = sld [smem:[#allocation3 + $0x82]] }
  0x2e   : > { %v304_v8 = vstv %s597_s28  ;;  %s595_s15 = sld [smem:[#allocation3 + $0x83]] }
  0x2f   : > { %v241_v9 = vstv %s591_s30  ;;  %s598_s18 = sld [smem:[#allocation3 + $0x84]] }
  0x30   : > { %v968_v4 = vld [vmem:[#allocation2 + $0x4] sm:$0xf]  ;;  %v221_v10 = vstv %s589_s4  ;;  %s606_s23 = sld [smem:[#allocation3 + $0x7]]  ;;  %s841_s4 = smov 121  }
  0x31   : > { %v970_v5 = vld [vmem:[#allocation2] sm:$0xff]  ;;  %v274_v6 = vmul.f32 %v273_v2, %v968_v4  ;;  %v305_v12 = vmul.f32 %v304_v8, %v968_v4  ;;  %v335_v14 = vstv %s600_s19  ;;  %s590_s27 = sld [smem:[#allocation3 + $0x101]] }
  0x32   : > { %v211_v7 = vmul.f32 %v210_v3, %v970_v5  ;;  %v222_v11 = vmul.f32 %v221_v10, %v970_v5  ;;  %v242_v13 = vmul.f32 %v241_v9, %v970_v5  ;;  %v366_v15 = vstv %s603_s7  ;;  %s593_s24 = sld [smem:[#allocation3 + $0x102]] }
  0x33   : > { %276 = vrot.lane.b32.xlu1 %v274_v6, %s835_s5  ;;  %v252_v16 = vstv %s592_s8  ;;  %v336_v17 = vmul.f32 %v335_v14, %v968_v4  ;;  %v367_v18 = vmul.f32 %v366_v15, %v968_v4  ;;  %s601_s28 = sld [smem:[#allocation3 + $0x85]] }
  0x34   : > { %213 = vrot.lane.b32.xlu0 %v211_v7, %s836_s6  ;;  %224 = vrot.lane.b32.xlu2 %v222_v11, %s836_s6  ;;  %v253_v19 = vmul.f32 %v252_v16, %v970_v5  ;;  %v284_v20 = vstv %s595_s15  ;;  %s604_s30 = sld [smem:[#allocation3 + $0x86]] }
  0x35   : > { %v315_v21 = vstv %s598_s18  ;;  %v285_v23 = vmul.f32 %v284_v20, %v968_v4  ;;  %s607_s19 = sld [smem:[#allocation3 + $0x87]] }
  0x36   : > { %v397_v22 = vstv %s606_s23  ;;  %v316_v24 = vmul.f32 %v315_v21, %v968_v4  ;;  %s596_s7 = sld [smem:[#allocation3 + $0x103]]  ;;  %s842_s23 = smov 3  }
  0x37   : > { %v398_v25 = vmul.f32 %v397_v22, %v968_v4  ;;  %v231_v26 = vstv %s590_s27  ;;  %s599_s8 = sld [smem:[#allocation3 + $0x104]] }
  0x38   : > { %v262_v27 = vstv %s593_s24  ;;  %v232_v29 = vmul.f32 %v231_v26, %v970_v5  ;;  %s605_s15 = sld [smem:[#allocation3 + $0x106]] }
  0x39   : > { %v346_v28 = vstv %s601_s28  ;;  %v263_v30 = vmul.f32 %v262_v27, %v970_v5  ;;  %s602_s18 = sld [smem:[#allocation3 + $0x105]] }
  0x3a   : > { %v347_v31 = vmul.f32 %v346_v28, %v968_v4  ;;  %v377_v32 = vstv %s604_s30 }
  0x3b   : > { %307 = vrot.lane.b32.xlu1 %v305_v12, %s837_s16  ;;  %v408_v33 = vstv %s607_s19  ;;  %v378_v35 = vmul.f32 %v377_v32, %v968_v4 }
  0x3c   : > { %244 = vrot.lane.b32.xlu0 %v242_v13, %s838_s21  ;;  %338 = vrot.lane.b32.xlu2 %v336_v17, %s839_s26  ;;  %v294_v34 = vstv %s596_s7  ;;  %v409_v36 = vmul.f32 %v408_v33, %v968_v4  ;;  %s464_s7 = scalar_lea.sflag [#allocation5], %s959_s22 }
  0x3d   : > { %v295_v37 = vmul.f32 %v294_v34, %v968_v4  ;;  %v325_v38 = vstv %s599_s8 }
  0x3e   : > { %v387_v39 = vstv %s605_s15  ;;  %v326_v41 = vmul.f32 %v325_v38, %v968_v4 }
  0x3f   : > { %v356_v40 = vstv %s602_s18  ;;  %v388_v42 = vmul.f32 %v387_v39, %v968_v4 }
  0x40   : > { %v357_v43 = vmul.f32 %v356_v40, %v968_v4 }
  0x43   : > { %369 = vrot.lane.b32.xlu1 %v367_v18, %s840_s17 }
  0x44   : > { %255 = vrot.lane.b32.xlu0 %v253_v19, %s838_s21  ;;  %287 = vrot.lane.b32.xlu2 %v285_v23, %s835_s5 }
  0x4b   : > { %318 = vrot.lane.b32.xlu1 %v316_v24, %s837_s16 }
  0x4c   : > { %400 = vrot.lane.b32.xlu0 %v398_v25, %s841_s4  ;;  %234 = vrot.lane.b32.xlu2 %v232_v29, %s836_s6  ;;  %s608_s6 = sld [smem:[#allocation3 + $0x107]] }
  0x52   : > { %v418_v44 = vstv %s608_s6  ;;  %s765_s6 = scalar_lea.hbm %s1091_s2, 24 }
  0x53   : > { %265 = vrot.lane.b32.xlu1 %v263_v30, %s838_s21  ;;  %v419_v45 = vmul.f32 %v418_v44, %v968_v4  ;;  %s587_s21 = sld [smem:[#allocation3 + $0x100]] }
  0x54   : > { %349 = vrot.lane.b32.xlu0 %v347_v31, %s839_s26  ;;  %380 = vrot.lane.b32.xlu2 %v378_v35, %s840_s17 }
  0x59   : > { %v207_v35 = vstv %s587_s21 }
  0x5a   : > { %v208_v44 = vmul.f32 %v207_v35, %v970_v5 }
  0x5b   : > { %411 = vrot.lane.b32.xlu1 %v409_v36, %s841_s4 }
  0x5c   : > { %297 = vrot.lane.b32.xlu0 %v295_v37, %s835_s5  ;;  %328 = vrot.lane.b32.xlu2 %v326_v41, %s837_s16  ;;  %s200_s5 = sld [smem:[#allocation3]] }
  0x5d   : > { %s586_s16 = sld [smem:[#allocation3 + $0x80]] }
  0x62   : > { %v201_v50 = vstv %s200_s5 }
  0x63   : > { %390 = vrot.lane.b32.xlu1 %v388_v42, %s840_s17  ;;  %v202_v52 = vmul.f32 %v201_v50, %v970_v5  ;;  %v204_v9 = vstv %s586_s16  ;;  %s615_s17 = smul.u32 12, %s823_s12 }
  0x64   : > { %359 = vrot.lane.b32.xlu0 %v357_v43, %s839_s26  ;;  %421 = vrot.lane.b32.xlu2 %v419_v45, %s841_s4  ;;  %v205_v15 = vmul.f32 %v204_v9, %v970_v5  ;;  %s614_s26 = smul.u32 12, %s959_s22 }
  0x65   : > { %s476_s30 = scalar_lea.hbm %s1091_s2, %s615_s17 }
  0x66   : > { %s191_s27 = scalar_lea.vmem [#allocation8], %s614_s26  ;;  %s479_s19 = sshll.u32 %s476_s30, 4  ;;  %s480_s19 = int_to_ptr.hbm [resolvable:$true] %s479_s19 }
  0x67   : > { %s477_s4 = sshll.u32 %s191_s27, 4  ;;  %s759_s8 = sshra.s32 %s480_s19, 4  ;;  %s478_s4 = int_to_ptr.vmem [resolvable:$true] %s477_s4  ;;  %s760_s8 = int_to_ptr.hbm [resolvable:$true] %s759_s8 }
  0x68   : > { %s761_s12 = scalar_lea.hbm %s760_s8, 12  ;;  %p766_p8 = scmp.lt.s32.totalorder %s760_s8, %s1091_s2 }
  0x69   : > { %p762_p1 = scmp.ne.s32.totalorder %s760_s8, %s761_s12  ;;  %p767_p11 = scmp.lt.s32.totalorder %s765_s6, %s761_s12 }
  0x6b   : > { %p763_p2 = pnand %p762_p1, %p938_p9  ;;  %p768_p12 = por %p767_p11, %p766_p8 }
  0x6d   : > { %p764_p4 = pneg %p763_p2 }
  0x6f   : > { %p769_p13 = pnand %p768_p12, %p764_p4 }
  0x8e   : > { %v225_v46 = vpop.permute.xlu2 %224 }
  0x8f   : > { %v226_v10 = vrot.slane %v225_v46, 4 }
  0x91   : > { %v227_v18 = vsel %vm216_vm4, %v225_v46, %v226_v10 }
  0x92   : > { %v229_v25 = vadd.f32 %v227_v18, %v205_v15 }
  0x96   : > { %v339_v47 = vpop.permute.xlu2 %338 }
  0x97   : > { %v340_v4 = vrot.slane %v339_v47, 4 }
  0x99   : > { %v342_v11 = vsel %vm341_vm8, %v340_v4, %v339_v47 }
  0x9e   : > { %v288_v54 = vpop.permute.xlu2 %287 }
  0x9f   : > { %v289_v22 = vrot.slane %v288_v54, 4 }
  0xa1   : > { %v290_v29 = vsel %vm279_vm6, %v289_v22, %v288_v54 }
  0xa5   : > { %v277_v48 = vpop.permute.xlu1 %276 }
  0xa6   : > { %v214_v49 = vpop.permute.xlu0 %213  ;;  %v278_v57 = vrot.slane %v277_v48, 4  ;;  %v235_v6 = vpop.permute.xlu2 %234 }
  0xa7   : > { %v215_v51 = vrot.slane %v214_v49, 4  ;;  %v236_v36 = vrot.slane %v235_v6, 4 }
  0xa8   : > { %v280_v62 = vsel %vm279_vm6, %v278_v57, %v277_v48 }
  0xa9   : > { %v217_v53 = vsel %vm216_vm4, %v214_v49, %v215_v51  ;;  %v237_v46 = vsel %vm216_vm4, %v235_v6, %v236_v36 }
  0xaa   : > { %v219_v59 = vadd.f32 %v217_v53, %v202_v52  ;;  %v239_v53 = vadd.f32 %v237_v46, %v208_v44 }
  0xad   : > { %v308_v55 = vpop.permute.xlu1 %307 }
  0xae   : > { %v245_v56 = vpop.permute.xlu0 %244  ;;  %v309_v63 = vrot.slane %v308_v55, 4  ;;  %v381_v24 = vpop.permute.xlu2 %380 }
  0xaf   : > { %v246_v58 = vrot.slane %v245_v56, 4  ;;  %v382_v38 = vrot.slane %v381_v24, 4 }
  0xb0   : > { %v311_v3 = vsel %vm310_vm7, %v309_v63, %v308_v55 }
  0xb1   : > { %v248_v60 = vsel %vm247_vm5, %v245_v56, %v246_v58  ;;  %v383_v47 = vsel %vm372_vm9, %v382_v38, %v381_v24 }
  0xb2   : > { %v250_v61 = vadd.f32 %v248_v60, %v219_v59 }
  0xb4   : > { %v282_v0 = vadd.f32 %v280_v62, %v250_v61 }
  0xb5   : > { %v370_v1 = vpop.permute.xlu1 %369 }
  0xb6   : > { %v256_v2 = vpop.permute.xlu0 %255  ;;  %v313_v7 = vadd.f32 %v311_v3, %v282_v0  ;;  %v371_v8 = vrot.slane %v370_v1, 4  ;;  %v329_v43 = vpop.permute.xlu2 %328 }
  0xb7   : > { %v257_v14 = vrot.slane %v256_v2, 4  ;;  %v330_v56 = vrot.slane %v329_v43, 4 }
  0xb8   : > { %v344_v12 = vadd.f32 %v342_v11, %v313_v7  ;;  %v373_v13 = vsel %vm372_vm9, %v371_v8, %v370_v1 }
  0xb9   : > { %v258_v21 = vsel %vm247_vm5, %v256_v2, %v257_v14  ;;  %v331_v60 = vsel %vm310_vm7, %v330_v56, %v329_v43 }
  0xba   : > { %v375_v20 = vadd.f32 %v373_v13, %v344_v12  ;;  %v260_v28 = vadd.f32 %v258_v21, %v229_v25 }
  0xbc   : > { %v292_v34 = vadd.f32 %v290_v29, %v260_v28 }
  0xbd   : > { %v319_v16 = vpop.permute.xlu1 %318 }
  0xbe   : > { %v401_v17 = vpop.permute.xlu0 %400  ;;  %v320_v27 = vrot.slane %v319_v16, 4  ;;  %v422_v61 = vpop.permute.xlu2 %421 }
  0xbf   : > { %v402_v19 = vrot.slane %v401_v17, 4  ;;  %v423_v4 = vrot.slane %v422_v61, 4 }
  0xc0   : > { %v321_v32 = vsel %vm310_vm7, %v320_v27, %v319_v16 }
  0xc1   : > { %v404_v23 = vsel %vm403_vm10, %v402_v19, %v401_v17  ;;  %v323_v39 = vadd.f32 %v321_v32, %v292_v34  ;;  %v424_v11 = vsel %vm403_vm10, %v423_v4, %v422_v61 }
  0xc2   : > { %v406_v26 = vadd.f32 %v404_v23, %v375_v20 }
  0xc4   : > { %428 = vst [vmem:[#allocation1] ss:$2 sm:$0xff] %v406_v26 }
  0xc5   : > { %v266_v30 = vpop.permute.xlu1 %265 }
  0xc6   : > { %v350_v31 = vpop.permute.xlu0 %349  ;;  %v267_v40 = vrot.slane %v266_v30, 4 }
  0xc7   : > { %v351_v33 = vrot.slane %v350_v31, 4 }
  0xc8   : > { %v268_v50 = vsel %vm247_vm5, %v266_v30, %v267_v40 }
  0xc9   : > { %v352_v37 = vsel %vm341_vm8, %v351_v33, %v350_v31  ;;  %v270_v57 = vadd.f32 %v268_v50, %v239_v53 }
  0xca   : > { %v354_v45 = vadd.f32 %v352_v37, %v323_v39 }
  0xcb   : > { %v430_v41 = vld.sshfl [vmem:[#allocation1 + $0x8] sm:$0xff pattern:$0x75316420]  ;;  %v429_v42 = vld.sshfl [vmem:[#allocation1] sm:$0xff pattern:$0x75316420] }
  0xcc   : > { %433 = vrot.lane.b32.xlu1 %v430_v41, %s842_s23  ;;  %431 = vrot.lane.b32.xlu0 %v429_v42, %s842_s23  ;;  %v385_v54 = vadd.f32 %v383_v47, %v354_v45 }
  0xcd   : > { %v412_v48 = vpop.permute.xlu1 %411 }
  0xce   : > { %v298_v49 = vpop.permute.xlu0 %297  ;;  %v413_v51 = vrot.slane %v412_v48, 4 }
  0xcf   : > { %v299_v52 = vrot.slane %v298_v49, 4 }
  0xd0   : > { %v414_v5 = vsel %vm403_vm10, %v413_v51, %v412_v48 }
  0xd1   : > { %v300_v55 = vsel %vm279_vm6, %v299_v52, %v298_v49  ;;  %v416_v58 = vadd.f32 %v414_v5, %v385_v54 }
  0xd2   : > { %v302_v59 = vadd.f32 %v300_v55, %v270_v57 }
  0xd3   : > { %440 = vst [vmem:[#allocation1] ss:$2 sm:$0xff] %v416_v58 }
  0xd4   : > { %v333_v2 = vadd.f32 %v331_v60, %v302_v59 }
  0xd5   : > { %v391_v62 = vpop.permute.xlu1 %390 }
  0xd6   : > { %v360_v63 = vpop.permute.xlu0 %359  ;;  %v392_v0 = vrot.slane %v391_v62, 4 }
  0xd7   : > { %v361_v1 = vrot.slane %v360_v63, 4 }
  0xd8   : > { %v393_v7 = vsel %vm372_vm9, %v392_v0, %v391_v62 }
  0xd9   : > { %v362_v3 = vsel %vm341_vm8, %v361_v1, %v360_v63 }
  0xda   : > { %v364_v6 = vadd.f32 %v362_v3, %v333_v2  ;;  %v442_v8 = vld.sshfl [vmem:[#allocation1 + $0x8] sm:$0xff pattern:$0x75316420]  ;;  %v441_v9 = vld.sshfl [vmem:[#allocation1] sm:$0xff pattern:$0x75316420] }
  0xdb   : > { %445 = vrot.lane.b32.xlu0 %v442_v8, %s842_s23  ;;  %443 = vrot.lane.b32.xlu2 %v441_v9, %s842_s23 }
  0xdc   : > { %v395_v10 = vadd.f32 %v393_v7, %v364_v6 }
  0xde   : > { %v426_v12 = vadd.f32 %v424_v11, %v395_v10 }
  0xe0   : > { %452 = vst [vmem:[#allocation1] ss:$2 sm:$0xff] %v426_v12 }
  0xe7   : > { %v454_v13 = vld.sshfl [vmem:[#allocation1 + $0x8] sm:$0xff pattern:$0x75316420]  ;;  %v453_v14 = vld.sshfl [vmem:[#allocation1] sm:$0xff pattern:$0x75316420] }
  0xe8   : > { %457 = vrot.lane.b32.xlu2 %v454_v13, %s842_s23  ;;  %455 = vrot.lane.b32.xlu1 %v453_v14, %s842_s23 }
 0x135   : > { %v444_v18 = vpop.permute.xlu2 %443 }
 0x13e   : > { %v434_v15 = vpop.permute.xlu1 %433  ;;  %v432_v16 = vpop.permute.xlu0 %431 }
 0x13f   : > { %v436_v17 = vsel %vm435_vm11, %v432_v16, %v434_v15 }
 0x140   : > { %438 = vst.msk [vmem:[%s191_s27] sm:$0xf] %vm197_vm2, %v436_v17 }
 0x142   : > { %v458_v21 = vpop.permute.xlu2 %457 }
 0x14d   : > { %v446_v19 = vpop.permute.xlu0 %445 }
 0x14e   : > { %v447_v20 = vsel %vm435_vm11, %v444_v18, %v446_v19 }
 0x14f   : > { %609 = vst.msk [vmem:[%s191_s27 + $0x4] sm:$0xf] %vm197_vm2, %v447_v20 }
 0x15a   : > { %v456_v22 = vpop.permute.xlu1 %455 }
 0x15b   : > { %v459_v23 = vsel %vm435_vm11, %v456_v22, %v458_v21 }
 0x15c   : > { %610 = vst.msk [vmem:[%s191_s27 + $0x8] sm:$0xf] %vm197_vm2, %v459_v23 }
 0x15d   : > { %772 = shalt.err (!%p769_p13)
}
 0x15e   : > { %s843_s22 = smov 64   ;;  %s844_s21 = smov 4  }
 0x15f   : > { %622 = dma.vmem_to_hbm [thread:$0]  (%p938_p9), %s478_s4, 192, %s480_s19, %s464_s7, %s843_s22, %s843_s22, %s844_s21  }
 0x160 PF: > { %s494_s23 = sand.u32 1, %s811_s9   ;;  %p1098_p0 = scmp.ge.s32.totalorder %s831_s14, 2 }
 0x161   : > { %s495_s26 = scalar_lea.sflag [#allocation5], %s494_s23 }
 0x162   : > { %p633_p3 = pnand %p1098_p0, %p909_p6 }
 0x164   : > { %p634_p5 = pneg %p633_p3 }
 0x166   : > { %806 = dma.done.wait (%p634_p5), %s495_s26, 192  }
 0x167   : > { %808 = vsyncadd (%p634_p5), %s495_s26, 4294967104  ;;  %s19_s14 = sadd.s32 1, %s831_s14   ;;  %s1099_s9 = smov %s815_s10 }
 0x168   : > { %p16_p7 = scmp.ge.s32.totalorder %s19_s14, 4   ;;  %s1100_s10 = smov %s819_s11 }
 0x169   : > { %s1101_s11 = smov %s944_s3  ;;  %s1102_s12 = smov %s827_s13 }
 0x16a   : > { %s1103_s13 = smov %s1105_s25  ;;  %18 = sbr.rel (!%p16_p7) target bundleno = 7 (0x7), region = 80 }
 0x16f   :  { %501 = vsyncpa [#allocation4], 1 }
 0x170   :  { %503 = vsyncpa [#allocation4 + $0x1], 1 }
 0x171   :  { %504 = vsyncpa [#allocation5], 1 }
 0x172   :  { %506 = vsyncpa [#allocation5 + $0x1], 1 }
 0x173   :  { %507 = vsyncpa [#allocation6], 1 }
 0x174   :  { %509 = vsyncpa [#allocation6 + $0x1], 1 }

</bundles_post_ra>
